<compile_context>
chip_gen: v5e
topology: v5e:2x2
jax: 0.10.0
libtpu: 0.0.40
codegen_flags: <defaults>
</compile_context>

<pallas_src>
import functools

import jax
import jax.numpy as jnp
from jax.experimental import pallas as pl
from jax.experimental.pallas import tpu as pltpu


def _round_up(n, m):
    return (n + m - 1) // m * m


def _vae_kernel(x_ref, eps_ref, w1_ref, b1_ref, wh_ref, bh_ref,
                w3_ref, b3_ref, w41_ref, b41_ref,
                xmu_ref, zpk_ref, *, z_dim):
    """Fused VAE forward for one batch tile.

    x_ref   : (TB, XP)  bf16  zero-padded input
    eps_ref : (TB, ZP)  f32   N(0,1) noise pre-placed at lanes [2Z:3Z), 0 else
    w1_ref  : (XP, H)   bf16  rows >= x_dim are zero
    wh_ref  : (H, ZP)   bf16  cols: [0:Z)=w21, [Z:2Z)=w22, [2Z:3Z)=w21, rest 0
    w3_ref  : (ZP, H)   bf16  rows [2Z:3Z) hold fc3 weight, rest zero
    w41_ref : (H, XP)   bf16  cols [0:x_dim) hold fc41 weight, rest zero
    biases  : f32 row vectors (bh/b41 padded to ZP/XP lanes)
    xmu_ref : (TB, XP)        cols [0:x_dim) valid
    zpk_ref : (TB, ZP)        [0:Z)=z_mu, [Z:2Z)=z_logvar, [2Z:3Z)=z, rest 0
    """
    f32 = jnp.float32
    bf16 = jnp.bfloat16

    # ---- encoder: fc1 + ReLU (bf16 MXU inputs, f32 accumulation) ----
    h = jnp.dot(x_ref[...], w1_ref[...], preferred_element_type=f32) + b1_ref[...]
    h = jnp.maximum(h, 0.0)

    # ---- fused, 128-lane head: [mu | logvar | mu | 0] in one matmul ----
    head = (jnp.dot(h.astype(bf16), wh_ref[...], preferred_element_type=f32)
            + bh_ref[...])

    # ---- reparameterize, full-width (no narrow lane slices) ----
    # Shift logvar lanes [Z:2Z) onto the z lanes [2Z:3Z) via the XLU.
    lane = jax.lax.broadcasted_iota(jnp.int32, zpk_ref.shape, 1)
    z_mask = jnp.logical_and(lane >= 2 * z_dim, lane < 3 * z_dim)
    logvar_on_z = pltpu.roll(head, shift=z_dim, axis=1)
    std = jnp.exp(0.5 * jnp.where(z_mask, logvar_on_z, 0.0))   # exp(0)=1 off-lanes
    # eps is zero outside [2Z:3Z), so this is exact everywhere:
    #   lanes [0:2Z)  -> head (mu, logvar)     lanes [2Z:3Z) -> mu + eps*std = z
    #   lanes >= 3Z   -> 0
    packed = head + eps_ref[...] * std

    # one full-width, lane-dense store (single unmasked vst stream)
    zpk_ref[...] = packed.astype(zpk_ref.dtype)

    # ---- decoder: fc3 + ReLU directly from the register value ----
    # Rows of w3 outside [2Z:3Z) are zero, so mu/logvar/pad lanes contribute 0.
    h2 = (jnp.dot(packed.astype(bf16), w3_ref[...], preferred_element_type=f32)
          + b3_ref[...])
    h2 = jnp.maximum(h2, 0.0)

    # ---- fc41, padded to XP lanes for an unmasked store ----
    xmu_ref[...] = (jnp.dot(h2.astype(bf16), w41_ref[...],
                            preferred_element_type=f32)
                    + b41_ref[...]).astype(xmu_ref.dtype)


def vae_forward(x, params, eps, *, tile_b=None, out_dtype=jnp.float32,
                interpret=False):
    """Fused VAE forward.

    params: dict with 'w1','b1','w21','b21','w22','b22','w3','b3','w41','b41';
            weights already transposed to (in_dim, out_dim), biases (1, out).
    eps   : (B, z_dim) standard-normal noise.
    Returns (x_mu, z_mu, z_logvar, z), matching the PyTorch module's forward.
    """
    B, x_dim = x.shape
    z_dim = params["w21"].shape[1]
    hidden = params["w1"].shape[1]

    XP = _round_up(x_dim, 128)                 # lane-dense x / x_mu width
    ZP = max(128, _round_up(3 * z_dim, 128))   # lane-dense packed-z width

    # ---- batch tile: >=16 (bf16 sublane pack); >=2 grid steps when possible
    # (v7x: 2 TensorCores); multiples of 256 for large tiles (v6e/v7x MXU).
    if tile_b is None:
        b16 = _round_up(B, 16)
        if b16 < 32:
            tile_b = b16                       # too small to split across cores
        else:
            half = _round_up(pl.cdiv(b16, 2), 16)
            if half >= 256:
                half = _round_up(half, 256)
            tile_b = min(1024, half)
    B_pad = _round_up(B, tile_b)

    f32, bf16 = jnp.float32, jnp.bfloat16

    # ------- operand packing / padding (layout plumbing, done once) -------
    x_p = jnp.zeros((B_pad, XP), bf16).at[:B, :x_dim].set(x.astype(bf16))
    # noise pre-placed on the z lanes -> (8,128)-aligned DMA, no in-kernel shuffle
    eps_p = jnp.zeros((B_pad, ZP), f32).at[:B, 2 * z_dim:3 * z_dim].set(
        eps.astype(f32))

    w1_p = jnp.zeros((XP, hidden), bf16).at[:x_dim].set(params["w1"].astype(bf16))
    b1 = params["b1"].astype(f32).reshape(1, hidden)

    wh_p = (jnp.zeros((hidden, ZP), bf16)
            .at[:, 0:z_dim].set(params["w21"].astype(bf16))
            .at[:, z_dim:2 * z_dim].set(params["w22"].astype(bf16))
            .at[:, 2 * z_dim:3 * z_dim].set(params["w21"].astype(bf16)))
    bh_p = (jnp.zeros((1, ZP), f32)
            .at[:, 0:z_dim].set(params["b21"].astype(f32).reshape(1, z_dim))
            .at[:, z_dim:2 * z_dim].set(params["b22"].astype(f32).reshape(1, z_dim))
            .at[:, 2 * z_dim:3 * z_dim].set(params["b21"].astype(f32).reshape(1, z_dim)))

    w3_p = jnp.zeros((ZP, hidden), bf16).at[2 * z_dim:3 * z_dim].set(
        params["w3"].astype(bf16))
    b3 = params["b3"].astype(f32).reshape(1, hidden)

    w41_p = jnp.zeros((hidden, XP), bf16).at[:, :x_dim].set(
        params["w41"].astype(bf16))
    b41_p = jnp.zeros((1, XP), f32).at[:, :x_dim].set(
        params["b41"].astype(f32).reshape(1, x_dim))

    operands = (x_p, eps_p, w1_p, b1, wh_p, bh_p, w3_p, b3, w41_p, b41_p)

    # ------- grid / specs: batch-parallel grid, weights resident in VMEM ----
    grid = (B_pad // tile_b,)
    # NOTE: for very large `hidden` on v7x (64 MiB VMEM) switch the four weight
    # specs to pipeline_mode=pl.Buffered(1); on v5e, consider pl.Buffered(3)
    # on x/eps/outputs if the profile shows exposed DMA.
    in_specs = [
        pl.BlockSpec((tile_b, XP), lambda i: (i, 0)),          # x
        pl.BlockSpec((tile_b, ZP), lambda i: (i, 0)),          # eps (padded)
        pl.BlockSpec((XP, hidden), lambda i: (0, 0)),          # w1
        pl.BlockSpec((1, hidden), lambda i: (0, 0)),           # b1
        pl.BlockSpec((hidden, ZP), lambda i: (0, 0)),          # w_head (padded)
        pl.BlockSpec((1, ZP), lambda i: (0, 0)),               # b_head (padded)
        pl.BlockSpec((ZP, hidden), lambda i: (0, 0)),          # w3 (padded)
        pl.BlockSpec((1, hidden), lambda i: (0, 0)),           # b3
        pl.BlockSpec((hidden, XP), lambda i: (0, 0)),          # w41 (padded)
        pl.BlockSpec((1, XP), lambda i: (0, 0)),               # b41 (padded)
    ]
    out_specs = (
        pl.BlockSpec((tile_b, XP), lambda i: (i, 0)),          # x_mu (padded)
        pl.BlockSpec((tile_b, ZP), lambda i: (i, 0)),          # packed z outputs
    )
    out_shapes = (
        jax.ShapeDtypeStruct((B_pad, XP), out_dtype),
        jax.ShapeDtypeStruct((B_pad, ZP), out_dtype),
    )

    flops = 2 * B_pad * hidden * (XP + ZP + ZP + XP)
    out_bytes = (B_pad * XP + B_pad * ZP) * jnp.dtype(out_dtype).itemsize
    bytes_accessed = (sum(int(o.size) * o.dtype.itemsize for o in operands)
                      + out_bytes)
    cost = pl.CostEstimate(flops=flops,
                           transcendentals=B_pad * ZP,
                           bytes_accessed=bytes_accessed)

    xmu_p, zpk = pl.pallas_call(
        functools.partial(_vae_kernel, z_dim=z_dim),
        out_shape=out_shapes,
        grid_spec=pltpu.PrefetchScalarGridSpec(
            num_scalar_prefetch=0,
            grid=grid,
            in_specs=in_specs,
            out_specs=out_specs),
        compiler_params=pltpu.CompilerParams(
            dimension_semantics=("parallel",),
            vmem_limit_bytes=32 * 1024 * 1024),
        cost_estimate=cost,
        interpret=interpret,
    )(*operands)

    x_mu = xmu_p[:B, :x_dim]
    z_mu = zpk[:B, :z_dim]
    z_logvar = zpk[:B, z_dim:2 * z_dim]
    z = zpk[:B, 2 * z_dim:3 * z_dim]
    return x_mu, z_mu, z_logvar, z


def init_vae_params(key, x_dim, z_dim, hidden_nodes):
    """Deterministic init mimicking PyTorch nn.Linear (uniform +-1/sqrt(fan_in)).
    Weights are returned pre-transposed to (in_dim, out_dim)."""
    def linear(k, fan_in, fan_out):
        kw, kb = jax.random.split(k)
        bound = 1.0 / jnp.sqrt(fan_in)
        w = jax.random.uniform(kw, (fan_in, fan_out), jnp.float32, -bound, bound)
        b = jax.random.uniform(kb, (1, fan_out), jnp.float32, -bound, bound)
        return w, b

    k1, k21, k22, k3, k41 = jax.random.split(key, 5)
    w1, b1 = linear(k1, x_dim, hidden_nodes)
    w21, b21 = linear(k21, hidden_nodes, z_dim)
    w22, b22 = linear(k22, hidden_nodes, z_dim)
    w3, b3 = linear(k3, z_dim, hidden_nodes)
    w41, b41 = linear(k41, hidden_nodes, x_dim)
    return dict(w1=w1, b1=b1, w21=w21, b21=b21, w22=w22, b22=b22,
                w3=w3, b3=b3, w41=w41, b41=b41)


def _reference_forward(x, p, eps):
    """Pure-JAX reference mirroring the kernel's bf16-matmul / f32-accum
    numerics; elementwise math in f32."""
    bf16 = jnp.bfloat16

    def mm(a, w):
        return jnp.dot(a.astype(bf16), w.astype(bf16),
                       preferred_element_type=jnp.float32)

    h = jnp.maximum(mm(x, p["w1"]) + p["b1"], 0.0)
    z_mu = mm(h, p["w21"]) + p["b21"]
    z_logvar = mm(h, p["w22"]) + p["b22"]
    z = z_mu + eps * jnp.exp(0.5 * z_logvar)
    h2 = jnp.maximum(mm(z, p["w3"]) + p["b3"], 0.0)
    x_mu = mm(h2, p["w41"]) + p["b41"]
    return x_mu, z_mu, z_logvar, z


if __name__ == "__main__":
    # Small shapes consistent with the module: flat x_dim inputs.
    B, X_DIM, Z_DIM, HIDDEN = 8, 32, 16, 64

    key = jax.random.PRNGKey(0)
    k_params, k_x, k_eps = jax.random.split(key, 3)

    params = init_vae_params(k_params, X_DIM, Z_DIM, HIDDEN)
    x = jax.random.normal(k_x, (B, X_DIM), jnp.float32)
    # torch.randn_like(std) noise, drawn deterministically outside the kernel
    eps = jax.random.normal(k_eps, (B, Z_DIM), jnp.float32)

    outs = jax.block_until_ready(vae_forward(x, params, eps))
    refs = _reference_forward(x, params, eps)

    names = ("x_mu", "z_mu", "z_logvar", "z")
    for name, o, r in zip(names, outs, refs):
        assert o.shape == r.shape, (name, o.shape, r.shape)
        # bf16 matmul inputs => loosened tolerance vs. the f32 original.
        assert jnp.allclose(o, r, atol=1e-2, rtol=1e-2), (
            name, float(jnp.max(jnp.abs(o - r))))

    print("KERNEL_OK")
</pallas_src>

<mosaic_0001>
module attributes {stable_mosaic.version = 11 : i64} {
  func.func @_vae_kernel(%arg0: i32, %arg1: memref<16x128xbf16, #tpu.memory_space<vmem>>, %arg2: memref<16x128xf32, #tpu.memory_space<vmem>>, %arg3: memref<128x64xbf16, #tpu.memory_space<vmem>>, %arg4: memref<1x64xf32, #tpu.memory_space<vmem>>, %arg5: memref<64x128xbf16, #tpu.memory_space<vmem>>, %arg6: memref<1x128xf32, #tpu.memory_space<vmem>>, %arg7: memref<128x64xbf16, #tpu.memory_space<vmem>>, %arg8: memref<1x64xf32, #tpu.memory_space<vmem>>, %arg9: memref<64x128xbf16, #tpu.memory_space<vmem>>, %arg10: memref<1x128xf32, #tpu.memory_space<vmem>>, %arg11: memref<16x128xf32, #tpu.memory_space<vmem>>, %arg12: memref<16x128xf32, #tpu.memory_space<vmem>>) attributes {dimension_semantics = [#tpu.dimension_semantics<parallel>], iteration_bounds = array<i64: 1>, scalar_prefetch = 0 : i64, scratch_operands = 0 : i64, tpu.core_type = #tpu.core_type<tc>, window_params = [{transform_indices = @transform_0, window_bounds = array<i64: 16, 128>}, {transform_indices = @transform_1, window_bounds = array<i64: 16, 128>}, {pipeline_mode = #tpu.pipeline_mode<synchronous>, transform_indices = @transform_2, window_bounds = array<i64: 128, 64>}, {pipeline_mode = #tpu.pipeline_mode<synchronous>, transform_indices = @transform_3, window_bounds = array<i64: 1, 64>}, {pipeline_mode = #tpu.pipeline_mode<synchronous>, transform_indices = @transform_4, window_bounds = array<i64: 64, 128>}, {pipeline_mode = #tpu.pipeline_mode<synchronous>, transform_indices = @transform_5, window_bounds = array<i64: 1, 128>}, {pipeline_mode = #tpu.pipeline_mode<synchronous>, transform_indices = @transform_6, window_bounds = array<i64: 128, 64>}, {pipeline_mode = #tpu.pipeline_mode<synchronous>, transform_indices = @transform_7, window_bounds = array<i64: 1, 64>}, {pipeline_mode = #tpu.pipeline_mode<synchronous>, transform_indices = @transform_8, window_bounds = array<i64: 64, 128>}, {pipeline_mode = #tpu.pipeline_mode<synchronous>, transform_indices = @transform_9, window_bounds = array<i64: 1, 128>}, {transform_indices = @transform_10, window_bounds = array<i64: 16, 128>}, {transform_indices = @transform_11, window_bounds = array<i64: 16, 128>}]} {
    %c0 = arith.constant 0 : index
    %c0_0 = arith.constant 0 : index
    %0 = vector.load %arg1[%c0, %c0_0] : memref<16x128xbf16, #tpu.memory_space<vmem>>, vector<16x128xbf16>
    %c0_1 = arith.constant 0 : index
    %c0_2 = arith.constant 0 : index
    %1 = vector.load %arg3[%c0_1, %c0_2] : memref<128x64xbf16, #tpu.memory_space<vmem>>, vector<128x64xbf16>
    %cst = arith.constant dense<0.000000e+00> : vector<16x64xf32>
    %2 = tpu.matmul %0, %1, %cst {dimension_numbers = #tpu.dot_dimension_numbers<[1], [0], [0], [1], [0, 0, 1, 1], [], []>} : vector<16x128xbf16>, vector<128x64xbf16>, vector<16x64xf32> -> vector<16x64xf32>
    %c0_3 = arith.constant 0 : index
    %c0_4 = arith.constant 0 : index
    %3 = vector.load %arg4[%c0_3, %c0_4] : memref<1x64xf32, #tpu.memory_space<vmem>>, vector<1x64xf32>
    %4 = vector.broadcast %3 : vector<1x64xf32> to vector<16x64xf32>
    %5 = arith.addf %2, %4 : vector<16x64xf32>
    %cst_5 = arith.constant 0.000000e+00 : f32
    %6 = vector.broadcast %cst_5 : f32 to vector<16x64xf32>
    %7 = arith.maximumf %5, %6 : vector<16x64xf32>
    %8 = arith.truncf %7 : vector<16x64xf32> to vector<16x64xbf16>
    %c0_6 = arith.constant 0 : index
    %c0_7 = arith.constant 0 : index
    %9 = vector.load %arg5[%c0_6, %c0_7] : memref<64x128xbf16, #tpu.memory_space<vmem>>, vector<64x128xbf16>
    %cst_8 = arith.constant dense<0.000000e+00> : vector<16x128xf32>
    %10 = tpu.matmul %8, %9, %cst_8 {dimension_numbers = #tpu.dot_dimension_numbers<[1], [0], [0], [1], [0, 0, 1, 1], [], []>} : vector<16x64xbf16>, vector<64x128xbf16>, vector<16x128xf32> -> vector<16x128xf32>
    %c0_9 = arith.constant 0 : index
    %c0_10 = arith.constant 0 : index
    %11 = vector.load %arg6[%c0_9, %c0_10] : memref<1x128xf32, #tpu.memory_space<vmem>>, vector<1x128xf32>
    %12 = vector.broadcast %11 : vector<1x128xf32> to vector<16x128xf32>
    %13 = arith.addf %10, %12 : vector<16x128xf32>
    %14 = tpu.iota {dimensions = array<i32: 1>} : vector<16x128xi32>
    %c32_i32 = arith.constant 32 : i32
    %15 = vector.broadcast %c32_i32 : i32 to vector<16x128xi32>
    %16 = arith.cmpi sge, %14, %15 : vector<16x128xi32>
    %c48_i32 = arith.constant 48 : i32
    %17 = vector.broadcast %c48_i32 : i32 to vector<16x128xi32>
    %18 = arith.cmpi slt, %14, %17 : vector<16x128xi32>
    %19 = arith.andi %16, %18 : vector<16x128xi1>
    %c16_i32 = arith.constant 16 : i32
    %20 = tpu.dynamic_rotate %13 by %c16_i32 dim 1 : vector<16x128xf32>, i32 -> vector<16x128xf32>
    %cst_11 = arith.constant 0.000000e+00 : f32
    %21 = vector.broadcast %cst_11 : f32 to vector<16x128xf32>
    %22 = arith.select %19, %20, %21 : vector<16x128xi1>, vector<16x128xf32>
    %cst_12 = arith.constant 5.000000e-01 : f32
    %23 = vector.broadcast %cst_12 : f32 to vector<16x128xf32>
    %24 = arith.mulf %23, %22 : vector<16x128xf32>
    %25 = math.exp %24 : vector<16x128xf32>
    %c0_13 = arith.constant 0 : index
    %c0_14 = arith.constant 0 : index
    %26 = vector.load %arg2[%c0_13, %c0_14] : memref<16x128xf32, #tpu.memory_space<vmem>>, vector<16x128xf32>
    %27 = arith.mulf %26, %25 : vector<16x128xf32>
    %28 = arith.addf %13, %27 : vector<16x128xf32>
    %c0_15 = arith.constant 0 : index
    %c0_16 = arith.constant 0 : index
    %29 = vector.load %arg12[%c0_15, %c0_16] : memref<16x128xf32, #tpu.memory_space<vmem>>, vector<16x128xf32>
    tpu.vector_store %arg12[%c0_15, %c0_16], %28 {strides = array<i32>} : memref<16x128xf32, #tpu.memory_space<vmem>>, vector<16x128xf32>,
    %30 = arith.truncf %28 : vector<16x128xf32> to vector<16x128xbf16>
    %c0_17 = arith.constant 0 : index
    %c0_18 = arith.constant 0 : index
    %31 = vector.load %arg7[%c0_17, %c0_18] : memref<128x64xbf16, #tpu.memory_space<vmem>>, vector<128x64xbf16>
    %cst_19 = arith.constant dense<0.000000e+00> : vector<16x64xf32>
    %32 = tpu.matmul %30, %31, %cst_19 {dimension_numbers = #tpu.dot_dimension_numbers<[1], [0], [0], [1], [0, 0, 1, 1], [], []>} : vector<16x128xbf16>, vector<128x64xbf16>, vector<16x64xf32> -> vector<16x64xf32>
    %c0_20 = arith.constant 0 : index
    %c0_21 = arith.constant 0 : index
    %33 = vector.load %arg8[%c0_20, %c0_21] : memref<1x64xf32, #tpu.memory_space<vmem>>, vector<1x64xf32>
    %34 = vector.broadcast %33 : vector<1x64xf32> to vector<16x64xf32>
    %35 = arith.addf %32, %34 : vector<16x64xf32>
    %cst_22 = arith.constant 0.000000e+00 : f32
    %36 = vector.broadcast %cst_22 : f32 to vector<16x64xf32>
    %37 = arith.maximumf %35, %36 : vector<16x64xf32>
    %38 = arith.truncf %37 : vector<16x64xf32> to vector<16x64xbf16>
    %c0_23 = arith.constant 0 : index
    %c0_24 = arith.constant 0 : index
    %39 = vector.load %arg9[%c0_23, %c0_24] : memref<64x128xbf16, #tpu.memory_space<vmem>>, vector<64x128xbf16>
    %cst_25 = arith.constant dense<0.000000e+00> : vector<16x128xf32>
    %40 = tpu.matmul %38, %39, %cst_25 {dimension_numbers = #tpu.dot_dimension_numbers<[1], [0], [0], [1], [0, 0, 1, 1], [], []>} : vector<16x64xbf16>, vector<64x128xbf16>, vector<16x128xf32> -> vector<16x128xf32>
    %c0_26 = arith.constant 0 : index
    %c0_27 = arith.constant 0 : index
    %41 = vector.load %arg10[%c0_26, %c0_27] : memref<1x128xf32, #tpu.memory_space<vmem>>, vector<1x128xf32>
    %42 = vector.broadcast %41 : vector<1x128xf32> to vector<16x128xf32>
    %43 = arith.addf %40, %42 : vector<16x128xf32>
    %c0_28 = arith.constant 0 : index
    %c0_29 = arith.constant 0 : index
    %44 = vector.load %arg11[%c0_28, %c0_29] : memref<16x128xf32, #tpu.memory_space<vmem>>, vector<16x128xf32>
    tpu.vector_store %arg11[%c0_28, %c0_29], %43 {strides = array<i32>} : memref<16x128xf32, #tpu.memory_space<vmem>>, vector<16x128xf32>,
    return
  }
  func.func @transform_0(%arg0: i32) -> (i32, i32) {
    %c0_i32 = arith.constant 0 : i32
    %c0_i32_0 = arith.constant 0 : i32
    return %arg0, %c0_i32 : i32, i32
  }
  func.func @transform_1(%arg0: i32) -> (i32, i32) {
    %c0_i32 = arith.constant 0 : i32
    %c0_i32_0 = arith.constant 0 : i32
    return %arg0, %c0_i32 : i32, i32
  }
  func.func @transform_2(%arg0: i32) -> (i32, i32) {
    %c0_i32 = arith.constant 0 : i32
    %c0_i32_0 = arith.constant 0 : i32
    %c0_i32_1 = arith.constant 0 : i32
    return %c0_i32, %c0_i32_0 : i32, i32
  }
  func.func @transform_3(%arg0: i32) -> (i32, i32) {
    %c0_i32 = arith.constant 0 : i32
    %c0_i32_0 = arith.constant 0 : i32
    %c0_i32_1 = arith.constant 0 : i32
    return %c0_i32, %c0_i32_0 : i32, i32
  }
  func.func @transform_4(%arg0: i32) -> (i32, i32) {
    %c0_i32 = arith.constant 0 : i32
    %c0_i32_0 = arith.constant 0 : i32
    %c0_i32_1 = arith.constant 0 : i32
    return %c0_i32, %c0_i32_0 : i32, i32
  }
  func.func @transform_5(%arg0: i32) -> (i32, i32) {
    %c0_i32 = arith.constant 0 : i32
    %c0_i32_0 = arith.constant 0 : i32
    %c0_i32_1 = arith.constant 0 : i32
    return %c0_i32, %c0_i32_0 : i32, i32
  }
  func.func @transform_6(%arg0: i32) -> (i32, i32) {
    %c0_i32 = arith.constant 0 : i32
    %c0_i32_0 = arith.constant 0 : i32
    %c0_i32_1 = arith.constant 0 : i32
    return %c0_i32, %c0_i32_0 : i32, i32
  }
  func.func @transform_7(%arg0: i32) -> (i32, i32) {
    %c0_i32 = arith.constant 0 : i32
    %c0_i32_0 = arith.constant 0 : i32
    %c0_i32_1 = arith.constant 0 : i32
    return %c0_i32, %c0_i32_0 : i32, i32
  }
  func.func @transform_8(%arg0: i32) -> (i32, i32) {
    %c0_i32 = arith.constant 0 : i32
    %c0_i32_0 = arith.constant 0 : i32
    %c0_i32_1 = arith.constant 0 : i32
    return %c0_i32, %c0_i32_0 : i32, i32
  }
  func.func @transform_9(%arg0: i32) -> (i32, i32) {
    %c0_i32 = arith.constant 0 : i32
    %c0_i32_0 = arith.constant 0 : i32
    %c0_i32_1 = arith.constant 0 : i32
    return %c0_i32, %c0_i32_0 : i32, i32
  }
  func.func @transform_10(%arg0: i32) -> (i32, i32) {
    %c0_i32 = arith.constant 0 : i32
    %c0_i32_0 = arith.constant 0 : i32
    return %arg0, %c0_i32 : i32, i32
  }
  func.func @transform_11(%arg0: i32) -> (i32, i32) {
    %c0_i32 = arith.constant 0 : i32
    %c0_i32_0 = arith.constant 0 : i32
    return %arg0, %c0_i32 : i32, i32
  }
}

</mosaic_0001>

<bundles_post_ra>
// kernel: tpu_custom_call.1
= control target key start
LH: loop header
LB: loop body
LE: loop exit
PB: predicated region body
PF: predicated region fallthrough
CT: control target
= control target key end

     0   :  { %17 = vsyncpa [#allocation3], 0  ;;  %s747_s0 = inlined_call_operand.vmem [shape: bf16[16,128], index: 0, kind: input, shape index: {}]   ;;  %s748_s1 = inlined_call_operand.vmem [shape: f32[16,128], index: 1, kind: input, shape index: {}]   ;;  %s749_s2 = inlined_call_operand.vmem [shape: bf16[128,64], index: 2, kind: input, shape index: {}]   ;;  %s750_s3 = inlined_call_operand.vmem [shape: f32[1,64], index: 3, kind: input, shape index: {}]   ;;  %s751_s4 = inlined_call_operand.vmem [shape: bf16[64,128], index: 4, kind: input, shape index: {}]   ;;  %s752_s5 = inlined_call_operand.vmem [shape: f32[1,128], index: 5, kind: input, shape index: {}]   ;;  %s753_s6 = inlined_call_operand.vmem [shape: bf16[128,64], index: 6, kind: input, shape index: {}]   ;;  %s754_s7 = inlined_call_operand.vmem [shape: f32[1,64], index: 7, kind: input, shape index: {}]   ;;  %s755_s8 = inlined_call_operand.vmem [shape: bf16[64,128], index: 8, kind: input, shape index: {}]   ;;  %s756_s9 = inlined_call_operand.vmem [shape: f32[1,128], index: 9, kind: input, shape index: {}]   ;;  %s757_s10 = inlined_call_operand.hbm [shape: f32[16,128], index: 10, kind: output, shape index: {0}]   ;;  %s758_s11 = inlined_call_operand.hbm [shape: f32[16,128], index: 11, kind: output, shape index: {1}]  }
   0x1   :  { %v499_v0 = vld [vmem:[%s749_s2 + $0x38] sm:$0xff]  ;;  %v498_v1 = vld [vmem:[%s749_s2 + $0x30] sm:$0xff] }
   0x2   :  { %116 = vmatpush.bf16.msra.mxu0 %v499_v0 }
   0x3   :  { %18 = vsyncpa [#allocation5], 0  ;;  %v497_v2 = vld [vmem:[%s749_s2 + $0x28] sm:$0xff]  ;;  %v496_v3 = vld [vmem:[%s749_s2 + $0x20] sm:$0xff]  ;;  %vm169_vm0 = vcmask 523264   ;;  %s581_s28 = smov 16   ;;  %v187_v33 = vlaneseq }
   0x4   :  { %v495_v4 = vld [vmem:[%s749_s2 + $0x18] sm:$0xff]  ;;  %v494_v5 = vld [vmem:[%s749_s2 + $0x10] sm:$0xff]  ;;  %v493_v6 = vld [vmem:[%s749_s2 + $0x8] sm:$0xff]  ;;  %s582_s29 = smov [#allocation4]   ;;  %s583_s14 = smov 128  }
   0x5   :  { %v492_v7 = vld [vmem:[%s749_s2] sm:$0xff]  ;;  %v503_v9 = vld [vmem:[%s751_s4 + $0x18] sm:$0xff]  ;;  %v502_v10 = vld [vmem:[%s751_s4 + $0x10] sm:$0xff]  ;;  %v188_v35 = vand.u32 127, %v187_v33  ;;  %s370_s30 = sshll.u32 %s582_s29, 4  ;;  %s584_s15 = smov 8   ;;  %s371_s30 = int_to_ptr.vmem [resolvable:$true] %s370_s30 }
   0x6   :  { %117 = vmatpush.bf16.msra.mxu0 %v498_v1  ;;  %v491_v8 = vld [vmem:[%s747_s0] sm:$0xff]  ;;  %177 = vmatpush.bf16.msra.mxu1 %v503_v9  ;;  %v501_v11 = vld [vmem:[%s751_s4 + $0x8] sm:$0xff]  ;;  %v511_v21 = vld [vmem:[%s753_s6 + $0x38] sm:$0xff]  ;;  %s585_s16 = smov [#allocation2]   ;;  %s359_s20 = sshll.u32 %s757_s10, 4  ;;  %s360_s20 = int_to_ptr.hbm [resolvable:$true] %s359_s20 }
   0x7   :  { %v500_v12 = vld [vmem:[%s751_s4] sm:$0xff]  ;;  %281 = vmatpush.bf16.msra.mxu2 %v511_v21  ;;  %v510_v22 = vld [vmem:[%s753_s6 + $0x30] sm:$0xff]  ;;  %v509_v28 = vld [vmem:[%s753_s6 + $0x28] sm:$0xff]  ;;  %vm189_vm1 = vcmp.ge.s32.totalorder %v188_v35, 32  ;;  %vm190_vm2 = vcmp.lt.s32.totalorder %v188_v35, 48  ;;  %s357_s17 = sshll.u32 %s585_s16, 4  ;;  %s358_s17 = int_to_ptr.vmem [resolvable:$true] %s357_s17 }
   0x8   :  { %v521_v14 = vld [vmem:[%s750_s3] ss:$0 sm:$0xff]  ;;  %v507_v30 = vld [vmem:[%s753_s6 + $0x18] sm:$0xff]  ;;  %v506_v31 = vld [vmem:[%s753_s6 + $0x10] sm:$0xff] }
   0x9   :  { %v522_v23 = vld [vmem:[%s752_s5] ss:$0 sm:$0xff]  ;;  %v505_v32 = vld [vmem:[%s753_s6 + $0x8] sm:$0xff]  ;;  %vm191_vm3 = vmand %vm189_vm1, %vm190_vm2 }
   0xa   :  { %118 = vmatpush.bf16.msra.mxu0 %v497_v2  ;;  %178 = vmatpush.bf16.msra.mxu1 %v502_v10  ;;  %v508_v29 = vld [vmem:[%s753_s6 + $0x20] sm:$0xff]  ;;  %v205_v48 = vld [vmem:[%s748_s1 + $0x8] sm:$0xff]  ;;  %v515_v53 = vld [vmem:[%s755_s8 + $0x18] sm:$0xff] }
   0xb   :  { %282 = vmatpush.bf16.msra.mxu2 %v510_v22  ;;  %v504_v34 = vld [vmem:[%s753_s6] sm:$0xff]  ;;  %341 = vmatpush.bf16.msra.mxu3 %v515_v53  ;;  %v514_v54 = vld [vmem:[%s755_s8 + $0x10] sm:$0xff]  ;;  %v513_v55 = vld [vmem:[%s755_s8 + $0x8] sm:$0xff] }
   0xc   :  { %v204_v43 = vld [vmem:[%s748_s1] sm:$0xff] }
   0xd   :  { %v512_v56 = vld [vmem:[%s755_s8] sm:$0xff]  ;;  %s372_s8 = sshll.u32 %s758_s11, 4  ;;  %s373_s8 = int_to_ptr.hbm [resolvable:$true] %s372_s8 }
   0xe   :  { %119 = vmatpush.bf16.msra.mxu0 %v496_v3  ;;  %179 = vmatpush.bf16.msra.mxu1 %v501_v11  ;;  %v523_v58 = vld [vmem:[%s754_s7] ss:$0 sm:$0xff] }
   0xf   :  { %283 = vmatpush.bf16.msra.mxu2 %v509_v28  ;;  %342 = vmatpush.bf16.msra.mxu3 %v514_v54  ;;  %v524_v1 = vld [vmem:[%s756_s9] ss:$0 sm:$0xff] }
  0x12   :  { %120 = vmatpush.bf16.msra.mxu0 %v495_v4  ;;  %180 = vmatpush.bf16.msra.mxu1 %v500_v12 }
  0x13   :  { %284 = vmatpush.bf16.msra.mxu2 %v508_v29  ;;  %343 = vmatpush.bf16.msra.mxu3 %v513_v55 }
  0x16   :  { %121 = vmatpush.bf16.msra.mxu0 %v494_v5 }
  0x17   :  { %285 = vmatpush.bf16.msra.mxu2 %v507_v30  ;;  %344 = vmatpush.bf16.msra.mxu3 %v512_v56 }
  0x1a   :  { %122 = vmatpush.bf16.msra.mxu0 %v493_v6 }
  0x1b   :  { %286 = vmatpush.bf16.msra.mxu2 %v506_v31 }
  0x1e   :  { %123 = vmatpush.bf16.msra.mxu0 %v492_v7 }
  0x1f   :  { %287 = vmatpush.bf16.msra.mxu2 %v505_v32 }
  0x21   :  { %124 = vmatmul.bf16.vlgmr.msra.gmra.mxu0 %v491_v8 }
  0x23   :  { %288 = vmatpush.bf16.msra.mxu2 %v504_v34 }
  0x9e   :  { %v125_v13 = vpop.f32.mrf.mxu0 }
  0x9f   :  { %v126_v15 = vadd.f32 %v521_v14, %v125_v13 }
  0xa1   :  { %v130_v18 = vmax.f32 %v126_v15, 0.0 }
  0xa6   :  { %v127_v16 = vpop.f32.mrf.mxu0 }
  0xa7   :  { %v128_v17 = vadd.f32 %v521_v14, %v127_v16 }
  0xa9   :  { %v131_v19 = vmax.f32 %v128_v17, 0.0 }
  0xab   :  { %v132_v20 = vpack.c.bf16 %v131_v19, %v130_v18 }
  0xad   :  { %441 = vmatmul.msk.bf16.vlgmr.msra.gmra.mxu1 %vm169_vm0, %v132_v20 }
 0x12a   :  { %v182_v24 = vpop.f32.mrf.mxu1 }
 0x12b   :  { %v183_v25 = vadd.f32 %v522_v23, %v182_v24 }
 0x12d   :  { %192 = vrot.lane.b32.xlu0 %v183_v25, %s581_s28 }
 0x132   :  { %v184_v26 = vpop.f32.mrf.mxu1 }
 0x133   :  { %v185_v27 = vadd.f32 %v522_v23, %v184_v26 }
 0x135   :  { %194 = vrot.lane.b32.xlu0 %v185_v27, %s581_s28 }
 0x19f   :  { %v193_v36 = vpop.permute.xlu0 %192 }
 0x1a0   :  { %v196_v37 = vsel %vm191_vm3, %v193_v36, 0.0 }
 0x1a1   :  { %v198_v38 = vmul.f32 0.5, %v196_v37 }
 0x1a3   :  { %v200_v39 = vmul.f32 1.442695, %v198_v38 }
 0x1a5   :  { %525 = vpow2.f32 %v200_v39 }
 0x1a7   :  { %v195_v40 = vpop.permute.xlu0 %194 }
 0x1a8   :  { %v197_v41 = vsel %vm191_vm3, %v195_v40, 0.0 }
 0x1a9   :  { %v199_v42 = vmul.f32 0.5, %v197_v41 }
 0x1ab   :  { %v526_v44 = vpop.eup %525  ;;  %v202_v45 = vmul.f32 1.442695, %v199_v42 }
 0x1ac   :  { %v206_v46 = vmul.f32 %v526_v44, %v204_v43 }
 0x1ad   :  { %527 = vpow2.f32 %v202_v45 }
 0x1ae   :  { %v208_v47 = vadd.f32 %v206_v46, %v183_v25 }
 0x1b0   :  { %210 = vst [vmem:[#allocation4] sm:$0xff] %v208_v47 }
 0x1b3   :  { %v528_v49 = vpop.eup %527 }
 0x1b4   :  { %v207_v50 = vmul.f32 %v528_v49, %v205_v48 }
 0x1b6   :  { %v209_v51 = vadd.f32 %v207_v50, %v185_v27 }
 0x1b8   :  { %211 = vst [vmem:[#allocation4 + $0x8] sm:$0xff] %v209_v51  ;;  %v212_v52 = vpack.c.bf16 %v209_v51, %v208_v47 }
 0x1b9   :  { %378 = dma.vmem_to_hbm [thread:$0]  %s371_s30, 256, %s373_s8, [#allocation5], %s583_s14, %s583_s14, %s584_s15  }
 0x1ba   :  { %289 = vmatmul.bf16.vlgmr.msra.gmra.mxu2 %v212_v52 }
 0x23d   :  { %v290_v57 = vpop.f32.mrf.mxu2 }
 0x23e   :  { %v291_v59 = vadd.f32 %v523_v58, %v290_v57 }
 0x240   :  { %v295_v62 = vmax.f32 %v291_v59, 0.0 }
 0x245   :  { %v292_v60 = vpop.f32.mrf.mxu2 }
 0x246   :  { %v293_v61 = vadd.f32 %v523_v58, %v292_v60 }
 0x248   :  { %v296_v63 = vmax.f32 %v293_v61, 0.0 }
 0x24a   :  { %v297_v0 = vpack.c.bf16 %v296_v63, %v295_v62 }
 0x24c   :  { %490 = vmatmul.msk.bf16.vlgmr.msra.gmra.mxu3 %vm169_vm0, %v297_v0 }
 0x2cf   :  { %v346_v2 = vpop.f32.mrf.mxu3 }
 0x2d0   :  { %v347_v3 = vadd.f32 %v524_v1, %v346_v2 }
 0x2d2   :  { %351 = vst [vmem:[#allocation2] sm:$0xff] %v347_v3 }
 0x2d7   :  { %v348_v4 = vpop.f32.mrf.mxu3 }
 0x2d8   :  { %v349_v5 = vadd.f32 %v524_v1, %v348_v4 }
 0x2da   :  { %352 = vst [vmem:[#allocation2 + $0x8] sm:$0xff] %v349_v5 }
 0x2db   :  { %365 = dma.vmem_to_hbm [thread:$0]  %s358_s17, 256, %s360_s20, [#allocation3], %s583_s14, %s583_s14, %s584_s15  }
 0x2dc   :  { %577 = dma.done.wait [#allocation3], 256  }
 0x2dd   :  { %578 = vsyncadd [#allocation3], 4294967040 }
 0x2de   :  { %579 = dma.done.wait [#allocation5], 256  }
 0x2df   :  { %580 = vsyncadd [#allocation5], 4294967040 }
 0x2e0   :  { %387 = vsyncpa [#allocation3], 1 }
 0x2e1   :  { %388 = vsyncpa [#allocation5], 1 }

</bundles_post_ra>
